<compile_context>
chip_gen: v7x
topology: tpu7x:2x2x1
jax: 0.10.0
libtpu: 0.0.40
codegen_flags: <defaults>
</compile_context>

<pallas_src>
import jax
import jax.numpy as jnp
import numpy as np
from jax import lax
from jax.experimental import pallas as pl
from jax.experimental.pallas import tpu as pltpu


# ----------------------------------------------------------------------------
# helpers
# ----------------------------------------------------------------------------
def _round_up(x, m):
    return ((x + m - 1) // m) * m


def _cdiv(a, b):
    return (a + b - 1) // b


def _vmem_capacity_bytes():
    """Physical VMEM per TensorCore; conservative 64 MiB (v7x) fallback."""
    try:
        cap = int(pltpu.get_tpu_info().vmem_capacity_bytes)
        if cap > 0:
            return cap
    except Exception:
        pass
    return 64 * 1024 * 1024


def _has_multiple_tensorcores():
    """True on devices exposing >1 TensorCore (v4/v5p megacore, v7x)."""
    try:
        kind = jax.devices()[0].device_kind.lower()
    except Exception:
        return False
    if "lite" in kind or "v5e" in kind or "v6e" in kind:
        return False
    return any(tag in kind for tag in ("v7", "7x", "v4", "v5p", "v5 p"))


def _pick_block_i(intermediate, vmem_cap):
    """Largest multiple of 128 (<= target) dividing I; falls back to full I."""
    target = 512 if vmem_cap > 96 * 1024 * 1024 else 256
    if intermediate <= 128 or intermediate % 128 != 0:
        return intermediate  # no split; keeps correctness for odd sizes
    best = 128
    for cand in range(128, min(intermediate, target) + 1, 128):
        if intermediate % cand == 0:
            best = cand
    return best


def _vmem_need_bytes(block_t, block_i, H, itemsize):
    """Per-step VMEM: double-buffered tiles + f32 acc + f32 temporaries + slack."""
    w13_tile = H * 2 * block_i * itemsize
    w2_tile = block_i * H * itemsize
    x_tile = block_t * H * itemsize
    out_tile = block_t * H * itemsize
    gate_col = block_t * 4
    acc = block_t * H * 4
    temps = 16 * block_t * block_i          # gu [t,2bi] f32 + h f32/bf16 + slack
    internal = 4 * 1024 * 1024              # Pallas/Mosaic internal scratch
    return (2 * (w13_tile + w2_tile + x_tile + out_tile + gate_col)
            + acc + temps + internal)


def _pick_block_t(T, H, block_i, itemsize, vmem_cap, multi_core):
    target = 768 if vmem_cap > 96 * 1024 * 1024 else 512
    budget = int(vmem_cap * 0.85)           # ~8-10 MiB headroom below physical
    bt = max(8, min(_round_up(target, 8), _round_up(max(T, 1), 8)))
    while bt > 8 and _vmem_need_bytes(bt, block_i, H, itemsize) > budget:
        bt -= 8
    nT = _cdiv(T, bt)
    bt = _round_up(_cdiv(T, nT), 8)         # balance tiles, reduce pad waste
    if multi_core and nT == 1 and bt >= 16:
        bt = _round_up(_cdiv(T, 2), 8)      # give the 2nd TensorCore work
    return bt


# ----------------------------------------------------------------------------
# One-time weight preparation (load time, NOT the forward hot path)
# ----------------------------------------------------------------------------
def prepare_jamba_moe_weights(params, *, block_i=None, compute_dtype=jnp.bfloat16):
    """Re-lay out expert weights once into per-I-tile contiguous operands."""
    wg, wu, w2 = params["wg"], params["wu"], params["w2"]
    E, I, H = wg.shape
    vmem_cap = _vmem_capacity_bytes()
    if block_i is None:
        block_i = _pick_block_i(I, vmem_cap)
    assert I % block_i == 0 and (block_i == I or block_i % 128 == 0)
    nI = I // block_i

    # [E, I, H] -> per-tile transposed [E, nI, H, block_i], then fuse gate|up.
    wg_t = jnp.transpose(wg.reshape(E, nI, block_i, H), (0, 1, 3, 2))
    wu_t = jnp.transpose(wu.reshape(E, nI, block_i, H), (0, 1, 3, 2))
    w13 = jnp.concatenate([wg_t, wu_t], axis=-1).astype(compute_dtype)  # [E,nI,H,2bi]
    # [E, H, I] -> [E, nI, block_i, H]
    w2t = jnp.transpose(w2.reshape(E, H, nI, block_i), (0, 2, 3, 1)).astype(compute_dtype)

    # TODO(synk): optional fp8 weight storage on v7x (per-channel scales folded
    # into the f32 accumulator) to halve weight HBM traffic / VMEM footprint.
    wr = params.get("wr", None)
    if wr is not None:
        wr = jnp.asarray(wr)

    return {
        "w13": w13, "w2t": w2t, "wr": wr,
        "block_i": int(block_i), "num_experts": int(E),
        "hidden_size": int(H), "intermediate_size": int(I),
        "compute_dtype": compute_dtype, "vmem_cap": int(vmem_cap),
    }


# ----------------------------------------------------------------------------
# Fused MoE expert kernel (SwiGLU), one (token-tile, expert, I-tile) per step.
# ----------------------------------------------------------------------------
def _moe_kernel(counts_ref, x_ref, w13_ref, w2_ref, g_ref, o_ref, acc_ref):
    t = pl.program_id(0)
    e = pl.program_id(1)
    i = pl.program_id(2)
    n_e = pl.num_programs(1)
    n_i = pl.num_programs(2)

    @pl.when(jnp.logical_and(e == 0, i == 0))
    def _init():
        acc_ref[...] = jnp.zeros_like(acc_ref)

    # Skip this expert's MXU work entirely if no token in this tile routed to it.
    @pl.when(counts_ref[t * n_e + e] > 0)
    def _compute():
        block_i = w13_ref.shape[-1] // 2                       # static
        # Fused gate+up projection: single contiguous [H, 2*block_i] operand.
        gu = jnp.dot(x_ref[...], w13_ref[...],
                     preferred_element_type=jnp.float32)       # [tT, 2*bi] f32
        gate = gu[:, :block_i]
        up = gu[:, block_i:]
        # SwiGLU; fold the per-token routing weight into h (linear in up-proj).
        h = (gate * jax.nn.sigmoid(gate)) * up * g_ref[...]    # [tT, bi] f32
        # Down projection contribution of this I-tile, accumulated in f32.
        acc_ref[...] += jnp.dot(h.astype(w2_ref.dtype), w2_ref[...],
                                preferred_element_type=jnp.float32)

    @pl.when(jnp.logical_and(e == n_e - 1, i == n_i - 1))
    def _finalize():
        o_ref[...] = acc_ref[...].astype(o_ref.dtype)


def moe_experts(x, w13, w2t, gates_e, counts, *, block_t, block_i, out_dtype,
                vmem_cap):
    """x: [T_pad, H]; w13: [E, nI, H, 2*bi]; w2t: [E, nI, bi, H];
    gates_e: [E, T_pad, 1] f32; counts: [nT*E] int32 (SMEM scalar prefetch)."""
    T_pad, H = x.shape
    E, nI, _, _ = w13.shape
    I = nI * block_i
    nT = T_pad // block_t

    itemsize = jnp.dtype(x.dtype).itemsize
    w_bytes = (w13.size + w2t.size) * itemsize
    cost = pl.CostEstimate(
        flops=int(6 * T_pad * I * H * E),                 # dense upper bound
        transcendentals=int(T_pad * I * E),               # sigmoid
        bytes_accessed=int(w_bytes * nT + 2 * T_pad * H * itemsize
                           + gates_e.size * 4),
    )

    need = _vmem_need_bytes(block_t, block_i, H, itemsize)
    vmem_limit = int(min(vmem_cap, max(need, 32 * 1024 * 1024)))

    # TODO(synk): pipeline_mode=pl.Buffered(3) on the weight specs for v5e/v6e
    # (128 MiB VMEM) once the budget accounts for the third buffer.
    grid_spec = pltpu.PrefetchScalarGridSpec(
        num_scalar_prefetch=1,
        grid=(nT, E, nI),
        in_specs=[
            pl.BlockSpec((block_t, H), lambda t, e, i, c: (t, 0)),               # x
            pl.BlockSpec((None, None, H, 2 * block_i),
                         lambda t, e, i, c: (e, i, 0, 0)),                       # [Wg|Wu]
            pl.BlockSpec((None, None, block_i, H),
                         lambda t, e, i, c: (e, i, 0, 0)),                       # W2^T
            pl.BlockSpec((None, block_t, 1), lambda t, e, i, c: (e, t, 0)),      # gates
        ],
        out_specs=pl.BlockSpec((block_t, H), lambda t, e, i, c: (t, 0)),
        scratch_shapes=[pltpu.VMEM((block_t, H), jnp.float32)],
    )
    return pl.pallas_call(
        _moe_kernel,
        out_shape=jax.ShapeDtypeStruct((T_pad, H), out_dtype),
        grid_spec=grid_spec,
        compiler_params=pltpu.CompilerParams(
            dimension_semantics=("parallel", "arbitrary", "arbitrary"),
            vmem_limit_bytes=vmem_limit,
        ),
        cost_estimate=cost,
    )(counts, x, w13, w2t, gates_e)


# ----------------------------------------------------------------------------
# JambaMoE forward (flatten, route, tile/pad, expert kernel, unflatten)
# ----------------------------------------------------------------------------
def jamba_moe_forward(hidden_states, prepared, top_k, *, block_t=None):
    orig_shape = hidden_states.shape
    orig_dtype = hidden_states.dtype
    H = prepared["hidden_size"]
    E = prepared["num_experts"]
    block_i = prepared["block_i"]
    compute_dtype = prepared["compute_dtype"]

    x = hidden_states.reshape(-1, H)
    T = x.shape[0]

    # Router + softmax top-k (renormalize=False) — tiny matmul, left to XLA.
    if E > 1:
        logits = jnp.dot(x.astype(jnp.float32),
                         prepared["wr"].astype(jnp.float32).T)   # [T, E]
    else:
        logits = jnp.ones((T, 1), dtype=jnp.float32)
    probs = jax.nn.softmax(logits, axis=-1)
    topk_w, topk_ids = lax.top_k(probs, top_k)                   # [T, K]
    one_hot = jax.nn.one_hot(topk_ids, E, dtype=jnp.float32)     # [T, K, E]
    gates = jnp.einsum("tk,tke->te", topk_w, one_hot)            # dense [T, E]
    assign = jnp.max(one_hot, axis=1)                            # [T, E] in {0,1}

    itemsize = jnp.dtype(compute_dtype).itemsize
    vmem_cap = prepared["vmem_cap"]
    if block_t is None:
        block_t = _pick_block_t(T, H, block_i, itemsize, vmem_cap,
                                _has_multiple_tensorcores())
    block_t = max(8, _round_up(block_t, 8))
    T_pad = _round_up(T, block_t)
    nT = T_pad // block_t

    pad = T_pad - T
    x_p = jnp.pad(x, ((0, pad), (0, 0))).astype(compute_dtype)
    gates_p = jnp.pad(gates, ((0, pad), (0, 0)))
    assign_p = jnp.pad(assign, ((0, pad), (0, 0)))
    gates_e = jnp.transpose(gates_p, (1, 0))[:, :, None]         # [E, T_pad, 1] f32
    counts = assign_p.reshape(nT, block_t, E).sum(axis=1).astype(jnp.int32).reshape(-1)

    # TODO(synk): megablocks-style token-sorted dispatch (scalar-prefetched group
    # offsets in the x/out index_maps, grid (expert, group-tile, I)) to cut both
    # MXU work and weight streaming by ~E/top_k; the dense count-guarded loop
    # below still DMAs every expert's weights.
    out = moe_experts(x_p, prepared["w13"], prepared["w2t"], gates_e, counts,
                      block_t=block_t, block_i=block_i, out_dtype=orig_dtype,
                      vmem_cap=vmem_cap)
    return out[:T].reshape(orig_shape)


# ----------------------------------------------------------------------------
# Pure-JAX reference for correctness check
# ----------------------------------------------------------------------------
def jamba_moe_reference(hidden_states, params, top_k):
    orig_shape = hidden_states.shape
    H = orig_shape[-1]
    x = hidden_states.reshape(-1, H).astype(jnp.float32)
    E = params["wg"].shape[0]

    if E > 1:
        logits = x @ params["wr"].astype(jnp.float32).T
    else:
        logits = jnp.ones((x.shape[0], 1), dtype=jnp.float32)
    probs = jax.nn.softmax(logits, axis=-1)
    topk_w, topk_ids = lax.top_k(probs, top_k)
    one_hot = jax.nn.one_hot(topk_ids, E, dtype=jnp.float32)
    gates = jnp.sum(topk_w[:, :, None] * one_hot, axis=1)

    out = jnp.zeros_like(x)
    for e in range(E):
        g = x @ params["wg"][e].astype(jnp.float32).T
        u = x @ params["wu"][e].astype(jnp.float32).T
        h = (g * jax.nn.sigmoid(g)) * u
        y = h @ params["w2"][e].astype(jnp.float32).T
        out = out + gates[:, e:e + 1] * y
    return out.reshape(orig_shape).astype(hidden_states.dtype)


if __name__ == "__main__":
    # Small JambaConfig-like synthetic sizes (exercise both T- and I-tiling).
    batch, seq = 2, 8
    hidden_size = 32
    intermediate_size = 256
    num_experts = 4
    top_k = 2
    dtype = jnp.float32

    key = jax.random.PRNGKey(0)
    k_x, k_r, k_g, k_u, k_d = jax.random.split(key, 5)

    hidden_states = jax.random.normal(k_x, (batch, seq, hidden_size), dtype=dtype)

    params = {
        # router.weight: [num_experts, hidden_size]
        "wr": jax.random.normal(k_r, (num_experts, hidden_size), dtype=dtype) * 0.05,
        # experts w1 (gate proj): [E, intermediate, hidden]  (torch [out, in])
        "wg": jax.random.normal(k_g, (num_experts, intermediate_size, hidden_size),
                                dtype=dtype) * 0.05,
        # experts w3 (up proj): [E, intermediate, hidden]
        "wu": jax.random.normal(k_u, (num_experts, intermediate_size, hidden_size),
                                dtype=dtype) * 0.05,
        # experts w2 (down proj): [E, hidden, intermediate]
        "w2": jax.random.normal(k_d, (num_experts, hidden_size, intermediate_size),
                                dtype=dtype) * 0.05,
    }

    # One-time weight preparation — hoisted out of the forward / hot path.
    prepared = prepare_jamba_moe_weights(params, block_i=128)
    prepared["w13"].block_until_ready()
    prepared["w2t"].block_until_ready()

    out = jamba_moe_forward(hidden_states, prepared, top_k, block_t=8)
    out = jax.block_until_ready(out)

    ref = jax.block_until_ready(jamba_moe_reference(hidden_states, params, top_k))
    assert out.shape == hidden_states.shape
    np.testing.assert_allclose(np.asarray(out), np.asarray(ref), rtol=2e-2, atol=2e-2)

    print("KERNEL_OK")
</pallas_src>

<mosaic_0001>
module attributes {stable_mosaic.version = 11 : i64} {
  func.func @_moe_kernel(%arg0: i32, %arg1: i32, %arg2: i32, %arg3: memref<8xi32, #tpu.memory_space<smem>>, %arg4: memref<8x32xbf16, #tpu.memory_space<vmem>>, %arg5: memref<1x1x32x256xbf16, #tpu.memory_space<vmem>>, %arg6: memref<1x1x128x32xbf16, #tpu.memory_space<vmem>>, %arg7: memref<1x8x1xf32, #tpu.memory_space<vmem>>, %arg8: memref<8x32xf32, #tpu.memory_space<vmem>>, %arg9: memref<8x32xf32, #tpu.memory_space<vmem>>) attributes {dimension_semantics = [#tpu.dimension_semantics<parallel>, #tpu.dimension_semantics<arbitrary>, #tpu.dimension_semantics<arbitrary>], iteration_bounds = array<i64: 2, 4, 2>, scalar_prefetch = 1 : i64, scratch_operands = 1 : i64, tpu.core_type = #tpu.core_type<tc>, window_params = [{transform_indices = @transform_0, window_bounds = array<i64: 8, 32>}, {transform_indices = @transform_1, window_bounds = array<i64: 1, 1, 32, 256>}, {transform_indices = @transform_2, window_bounds = array<i64: 1, 1, 128, 32>}, {transform_indices = @transform_3, window_bounds = array<i64: 1, 8, 1>}, {transform_indices = @transform_4, window_bounds = array<i64: 8, 32>}]} {
    %c0_i32 = arith.constant 0 : i32
    %0 = arith.cmpi eq, %arg1, %c0_i32 : i32
    %c0_i32_0 = arith.constant 0 : i32
    %1 = arith.cmpi eq, %arg2, %c0_i32_0 : i32
    %2 = arith.andi %0, %1 : i1
    %3 = arith.extui %2 : i1 to i32
    %c0_i32_1 = arith.constant 0 : i32
    %4 = arith.cmpi ne, %3, %c0_i32_1 : i32
    scf.if %4 {
      %cst = arith.constant 0.000000e+00 : f32
      %17 = vector.broadcast %cst : f32 to vector<8x32xf32>
      %c0 = arith.constant 0 : index
      %c0_5 = arith.constant 0 : index
      %18 = vector.load %arg9[%c0, %c0_5] : memref<8x32xf32, #tpu.memory_space<vmem>>, vector<8x32xf32>
      tpu.vector_store %arg9[%c0, %c0_5], %17 {strides = array<i32>} : memref<8x32xf32, #tpu.memory_space<vmem>>, vector<8x32xf32>,
    } else {
    }
    %c4_i32 = arith.constant 4 : i32
    %5 = arith.muli %arg0, %c4_i32 : i32
    %6 = arith.addi %5, %arg1 : i32
    %7 = arith.index_cast %6 : i32 to index
    %8 = memref.load %arg3[%7] : memref<8xi32, #tpu.memory_space<smem>>
    %c0_i32_2 = arith.constant 0 : i32
    %9 = arith.cmpi sgt, %8, %c0_i32_2 : i32
    %10 = arith.extui %9 : i1 to i32
    %c0_i32_3 = arith.constant 0 : i32
    %11 = arith.cmpi ne, %10, %c0_i32_3 : i32
    scf.if %11 {
      %c0 = arith.constant 0 : index
      %c0_5 = arith.constant 0 : index
      %17 = vector.load %arg4[%c0, %c0_5] : memref<8x32xbf16, #tpu.memory_space<vmem>>, vector<8x32xbf16>
      %c0_6 = arith.constant 0 : index
      %c0_7 = arith.constant 0 : index
      %c0_8 = arith.constant 0 : index
      %c0_9 = arith.constant 0 : index
      %18 = vector.load %arg5[%c0_6, %c0_7, %c0_8, %c0_9] : memref<1x1x32x256xbf16, #tpu.memory_space<vmem>>, vector<1x1x32x256xbf16>
      %19 = vector.shape_cast %18 : vector<1x1x32x256xbf16> to vector<32x256xbf16>
      %cst = arith.constant dense<0.000000e+00> : vector<8x256xf32>
      %20 = tpu.matmul %17, %19, %cst {dimension_numbers = #tpu.dot_dimension_numbers<[1], [0], [0], [1], [0, 0, 1, 1], [], []>} : vector<8x32xbf16>, vector<32x256xbf16>, vector<8x256xf32> -> vector<8x256xf32>
      %21 = vector.extract_strided_slice %20 {offsets = [0, 0], sizes = [8, 128], strides = [1, 1]} : vector<8x256xf32> to vector<8x128xf32>
      %22 = vector.extract_strided_slice %20 {offsets = [0, 128], sizes = [8, 128], strides = [1, 1]} : vector<8x256xf32> to vector<8x128xf32>
      %23 = arith.negf %21 : vector<8x128xf32>
      %24 = math.exp %23 : vector<8x128xf32>
      %cst_10 = arith.constant 1.000000e+00 : f32
      %25 = vector.broadcast %cst_10 : f32 to vector<8x128xf32>
      %26 = arith.addf %25, %24 : vector<8x128xf32>
      %27 = arith.divf %25, %26 : vector<8x128xf32>
      %28 = arith.mulf %21, %27 : vector<8x128xf32>
      %29 = arith.mulf %28, %22 : vector<8x128xf32>
      %c0_11 = arith.constant 0 : index
      %c0_12 = arith.constant 0 : index
      %c0_13 = arith.constant 0 : index
      %30 = vector.load %arg7[%c0_11, %c0_12, %c0_13] : memref<1x8x1xf32, #tpu.memory_space<vmem>>, vector<1x8x1xf32>
      %31 = vector.shape_cast %30 : vector<1x8x1xf32> to vector<8x1xf32>
      %32 = vector.broadcast %31 : vector<8x1xf32> to vector<8x128xf32>
      %33 = arith.mulf %29, %32 : vector<8x128xf32>
      %c0_14 = arith.constant 0 : index
      %c0_15 = arith.constant 0 : index
      %34 = vector.load %arg9[%c0_14, %c0_15] : memref<8x32xf32, #tpu.memory_space<vmem>>, vector<8x32xf32>
      %35 = arith.truncf %33 : vector<8x128xf32> to vector<8x128xbf16>
      %c0_16 = arith.constant 0 : index
      %c0_17 = arith.constant 0 : index
      %c0_18 = arith.constant 0 : index
      %c0_19 = arith.constant 0 : index
      %36 = vector.load %arg6[%c0_16, %c0_17, %c0_18, %c0_19] : memref<1x1x128x32xbf16, #tpu.memory_space<vmem>>, vector<1x1x128x32xbf16>
      %37 = vector.shape_cast %36 : vector<1x1x128x32xbf16> to vector<128x32xbf16>
      %cst_20 = arith.constant dense<0.000000e+00> : vector<8x32xf32>
      %38 = tpu.matmul %35, %37, %cst_20 {dimension_numbers = #tpu.dot_dimension_numbers<[1], [0], [0], [1], [0, 0, 1, 1], [], []>} : vector<8x128xbf16>, vector<128x32xbf16>, vector<8x32xf32> -> vector<8x32xf32>
      %39 = arith.addf %34, %38 : vector<8x32xf32>
      %c0_21 = arith.constant 0 : index
      %c0_22 = arith.constant 0 : index
      %40 = vector.load %arg9[%c0_21, %c0_22] : memref<8x32xf32, #tpu.memory_space<vmem>>, vector<8x32xf32>
      tpu.vector_store %arg9[%c0_21, %c0_22], %39 {strides = array<i32>} : memref<8x32xf32, #tpu.memory_space<vmem>>, vector<8x32xf32>,
    } else {
    }
    %c3_i32 = arith.constant 3 : i32
    %12 = arith.cmpi eq, %arg1, %c3_i32 : i32
    %c1_i32 = arith.constant 1 : i32
    %13 = arith.cmpi eq, %arg2, %c1_i32 : i32
    %14 = arith.andi %12, %13 : i1
    %15 = arith.extui %14 : i1 to i32
    %c0_i32_4 = arith.constant 0 : i32
    %16 = arith.cmpi ne, %15, %c0_i32_4 : i32
    scf.if %16 {
      %c0 = arith.constant 0 : index
      %c0_5 = arith.constant 0 : index
      %17 = vector.load %arg9[%c0, %c0_5] : memref<8x32xf32, #tpu.memory_space<vmem>>, vector<8x32xf32>
      %c0_6 = arith.constant 0 : index
      %c0_7 = arith.constant 0 : index
      %18 = vector.load %arg8[%c0_6, %c0_7] : memref<8x32xf32, #tpu.memory_space<vmem>>, vector<8x32xf32>
      tpu.vector_store %arg8[%c0_6, %c0_7], %17 {strides = array<i32>} : memref<8x32xf32, #tpu.memory_space<vmem>>, vector<8x32xf32>,
    } else {
    }
    return
  }
  func.func @transform_0(%arg0: i32, %arg1: i32, %arg2: i32, %arg3: memref<8xi32, #tpu.memory_space<smem>>) -> (i32, i32) {
    %c0_i32 = arith.constant 0 : i32
    %c0_i32_0 = arith.constant 0 : i32
    return %arg0, %c0_i32 : i32, i32
  }
  func.func @transform_1(%arg0: i32, %arg1: i32, %arg2: i32, %arg3: memref<8xi32, #tpu.memory_space<smem>>) -> (i32, i32, i32, i32) {
    %c0_i32 = arith.constant 0 : i32
    %c0_i32_0 = arith.constant 0 : i32
    %c0_i32_1 = arith.constant 0 : i32
    return %arg1, %arg2, %c0_i32, %c0_i32_0 : i32, i32, i32, i32
  }
  func.func @transform_2(%arg0: i32, %arg1: i32, %arg2: i32, %arg3: memref<8xi32, #tpu.memory_space<smem>>) -> (i32, i32, i32, i32) {
    %c0_i32 = arith.constant 0 : i32
    %c0_i32_0 = arith.constant 0 : i32
    %c0_i32_1 = arith.constant 0 : i32
    return %arg1, %arg2, %c0_i32, %c0_i32_0 : i32, i32, i32, i32
  }
  func.func @transform_3(%arg0: i32, %arg1: i32, %arg2: i32, %arg3: memref<8xi32, #tpu.memory_space<smem>>) -> (i32, i32, i32) {
    %c0_i32 = arith.constant 0 : i32
    %c0_i32_0 = arith.constant 0 : i32
    return %arg1, %arg0, %c0_i32 : i32, i32, i32
  }
  func.func @transform_4(%arg0: i32, %arg1: i32, %arg2: i32, %arg3: memref<8xi32, #tpu.memory_space<smem>>) -> (i32, i32) {
    %c0_i32 = arith.constant 0 : i32
    %c0_i32_0 = arith.constant 0 : i32
    return %arg0, %c0_i32 : i32, i32
  }
}

</mosaic_0001>

<bundles_post_ra>
// kernel: tpu_custom_call.1
= control target key start
LH: loop header
LB: loop body
LE: loop exit
PB: predicated region body
PF: predicated region fallthrough
CT: control target
= control target key end

     0   :  { %s1219_s0 = inlined_call_operand.vmem [shape: s32[8], index: 0, kind: input, shape index: {}]   ;;  %s1220_s1 = inlined_call_operand.vmem [shape: bf16[16,32], index: 1, kind: input, shape index: {}]   ;;  %s1221_s2 = inlined_call_operand.vmem [shape: bf16[4,2,32,256], index: 2, kind: input, shape index: {}]   ;;  %s1222_s3 = inlined_call_operand.vmem [shape: bf16[4,2,128,32], index: 3, kind: input, shape index: {}]   ;;  %s1223_s4 = inlined_call_operand.vmem [shape: f32[4,16,1], index: 4, kind: input, shape index: {}]   ;;  %s1224_s5 = inlined_call_operand.hbm [shape: f32[16,32], index: 5, kind: output, shape index: {}]  }
   0x1   :  { %1236 = sst [smem:[#allocation20_spill]] %s1220_s1  ;;  %s10_s20 = sshll.u32 %s1219_s0, 4  ;;  %s11_s20 = int_to_ptr.vmem [resolvable:$true] %s10_s20 }
   0x2   :  { %1237 = sst [smem:[#allocation21_spill]] %s1224_s5  ;;  %s861_s21 = scalar_lea.vmem %s11_s20, 16 }
   0x3   :  { %p862_p0 = scmp.ne.s32.totalorder %s11_s20, %s861_s21  ;;  %p866_p1 = scmp.lt.s32.totalorder %s11_s20, %s11_s20 }
   0x4   :  { %p867_p2 = scmp.lt.s32.totalorder %s861_s21, %s861_s21 }
   0x6   :  { %p868_p3 = por %p867_p2, %p866_p1 }
   0x8   :  { %p869_p4 = pnand %p868_p3, %p862_p0 }
   0xa   :  { %872 = shalt.err (!%p869_p4)  }
   0xb   :  { %s987_s22 = smov [#allocation4]  }
   0xc   :  { %13 = dma.vmem_to_smem %s11_s20, 16, %s987_s22, [#allocation3] }
   0xd   :  { %941 = dma.done.wait [#allocation3], 16 }
   0xe   :  { %942 = vsyncadd [#allocation3], 4294967280 }
   0xf   :  { %15 = sfence }
  0x10   :  { %16 = vsyncpa [#allocation6], 0 }
  0x11   :  { %18 = vsyncpa [#allocation6 + $0x1], 0  ;;  %s1026_s23 = smov 0   ;;  %s1028_s24 = smov 0  }
  0x12   :  { %s1030_s0 = smov 0   ;;  %s1032_s25 = smov 0  }
  0x13   :  { %s1034_s26 = smov 0   ;;  %s1036_s27 = smov 0  }
  0x14   :  { %s1038_s28 = smov 0   ;;  %s1040_s29 = smov 0  }
  0x15   :  { %s1042_s30 = smov 0   ;;  %s1044_s6 = smov 0  }
  0x16 LB: > { %1238 = sst [smem:[#allocation9_spill]] %s949_s23  ;;  %s686_s7 = sadd.s32 4294967295, %s985_s6   ;;  %s985_s6 = sphi %s1044_s6, %s24_s6   ;;  %s981_s30 = sphi %s1042_s30, %s1265_s30   ;;  %s977_s29 = sphi %s1040_s29, %s1264_s29   ;;  %s973_s28 = sphi %s1038_s28, %s1268_s28   ;;  %s969_s27 = sphi %s1036_s27, %s1262_s27   ;;  %s965_s26 = sphi %s1034_s26, %s1261_s26   ;;  %s961_s25 = sphi %s1032_s25, %s1260_s25   ;;  %s957_s0 = sphi %s1030_s0, %s1259_s0   ;;  %s953_s24 = sphi %s1028_s24, %s1267_s24   ;;  %s949_s23 = sphi %s1026_s23, %s1266_s23  }
  0x17   : > { %1239 = sst [smem:[#allocation10_spill]] %s957_s0  ;;  %s687_s8 = sadd.s32 4294967294, %s985_s6  }
  0x18   : > { %1240 = sst [smem:[#allocation11_spill]] %s973_s28  ;;  %s36_s9 = sadd.s32 1, %s973_s28 }
  0x19   : > { %1241 = sst [smem:[#allocation12_spill]] %s977_s29  ;;  %p37_p5 = scmp.ge.s32.totalorder %s36_s9, 2 }
  0x1a   : > { %1242 = sst [smem:[#allocation13_spill]] %s981_s30  ;;  %s39_s10 = sadd.s32 1, %s977_s29 }
  0x1b   : > { %1243 = sst [smem:[#allocation14_spill]] %s985_s6  ;;  %s43_s11 = sadd.s32 1, %s981_s30 }
  0x1c   : > { %p170_p6 = scmp.ne.s32.totalorder %s957_s0, %s953_s24  ;;  %s1270_s9 = smov (%p37_p5, %s36_s9), 0 }
  0x1d   : > { %1244 = sst [smem:[#allocation15_spill]] %s1270_s9  ;;  %s1272_s10 = smov (!%p37_p5, %s39_s10), %s977_s29 }
  0x1e   : > { %p171_p7 = scmp.eq.s32.totalorder %s686_s7, 15  ;;  %p176_p8 = scmp.ne.s32.totalorder %s953_s24, %s949_s23 }
  0x1f   : > { %p41_p9 = scmp.ge.s32.totalorder %s1272_s10, 4  ;;  %p177_p10 = scmp.eq.s32.totalorder %s687_s8, 15 }
  0x20   : > { %p1088_p11 = por %p171_p7, %p170_p6  ;;  %p690_p12 = scmp.ge.s32.totalorder %s985_s6, 1 }
  0x21   : > { %s1274_s10 = smov (%p41_p9, %s1272_s10), 0  ;;  %s1276_s11 = smov (!%p41_p9, %s43_s11), %s981_s30 }
  0x22   : > { %1246 = sst [smem:[#allocation16_spill]] %s1274_s10  ;;  %p1096_p13 = por %p177_p10, %p176_p8 }
  0x23   : > { %p237_p0 = scmp.lt.s32.totalorder %s985_s6, 17  ;;  %p45_p1 = scmp.ge.s32.totalorder %s1276_s11, 2 }
  0x24   : > { %s1247_s13 = scalar_select %p1096_p13, 1, 0 }
  0x25   : > { %p238_p2 = pnand %p690_p12, %p237_p0  ;;  %s1278_s11 = smov (%p45_p1, %s1276_s11), 0 }
  0x26   : > { %1248 = sst [smem:[#allocation17_spill]] %s1247_s13  ;;  %s157_s14 = ssub.s32 %s981_s30, %s1278_s11 }
  0x27   : > { %1249 = sst [smem:[#allocation18_spill]] %s1278_s11  ;;  %s160_s15 = sadd.s32 1, %s957_s0 }
  0x28   : > { %p158_p3 = scmp.eq.s32.totalorder %s157_s14, 0  ;;  %241 = sbr.rel (%p238_p2) target bundleno = 578 (0x242), region = 36 }
  0x29   : > { %s1226_s17 = sand.u32 (!%p238_p2), 1, %s953_s24   ;;  %p288_p4 = scmp.lt.s32.totalorder (!%p238_p2), %s969_s27, 1 }
  0x2a   : > { %s1107_s16 = scalar_select %p158_p3, %s957_s0, %s160_s15  }
  0x2b   : > { %s1113_s18 = sshll.u32 (!%p238_p2), %s1226_s17, 3  ;;  %p292_p5 = scmp.lt.s32.totalorder (!%p238_p2), %s965_s26, 3 }
  0x2c   : > { %1250 = sst [smem:[#allocation19_spill]] %s1107_s16  ;;  %p294_p6 = scmp.lt.s32.totalorder (!%p238_p2), %s961_s25, 1 }
  0x2d   : > { %p319_p7 = scmp.eq.s32.totalorder (!%p238_p2), %s965_s26, 0  ;;  %s1251_s1 = sld [smem:[#allocation20_spill]] (!%p238_p2) }
  0x2e   : > { %p320_p8 = scmp.eq.s32.totalorder (!%p238_p2), %s961_s25, 0 }
  0x2f   : > { %s289_s19 = scalar_select %p288_p4, %s969_s27, 1 }
  0x30   : > { %s293_s20 = scalar_select %p292_p5, %s965_s26, 3 }
  0x31   : > { %s692_s21 = sshll.u32 %s289_s19, 2  ;;  %p321_p9 = pnand %p320_p8, %p319_p7 }
  0x32   : > { %s694_s14 = sshll.u32 %s293_s20, 4  ;;  %s697_s11 = sshll.u32 %s293_s20, 5  ;;  %vm325_vm0 = vcmask (!%p321_p9), 261120   ;;  %v988_v0 = vmov (!%p321_p9), 0.0  }
  0x33   : > { %s1123_s8 = scalar_lea.vmem %s1251_s1, %s692_s21  ;;  %s699_s10 = sshll.u32 %s293_s20, 1  ;;  %326 = vst.msk [vmem:[#allocation2] sm:$0xff] (!%p321_p9), %vm325_vm0, %v988_v0 }
  0x34   : > { %s295_s15 = scalar_select %p294_p6, %s961_s25, 1 }
  0x35   : > { %s315_s7 = sadd.s32 %s699_s10, %s289_s19  ;;  %324 = sbr.rel (%p321_p9) target bundleno = 60 (0x3c), region = 40 }
  0x36   : > { %s693_s17 = sshll.u32 %s295_s15, 3  ;;  %s696_s9 = sshll.u32 %s295_s15, 4 }
  0x37   : > { %s298_s30 = sadd.s32 %s694_s14, %s693_s17  ;;  %s307_s29 = sadd.s32 %s697_s11, %s696_s9 }
  0x38   : > { %s695_s28 = sshll.u32 %s298_s30, 2  ;;  %s698_s16 = sshll.u32 %s307_s29, 2 }
  0x39   : > { %s300_s23 = scalar_lea.vmem %s1221_s2, %s695_s28  ;;  %s1132_s21 = scalar_lea.vmem %s1222_s3, %s698_s16 }
  0x3a   : > { %s700_s1 = sshll.u32 %s315_s7, 3  ;;  %s287_s30 = scalar_lea.vmem [#allocation5], %s1113_s18 }
  0x3b   : > { %s317_s15 = scalar_lea.vmem %s1223_s4, %s700_s1 }
  0x3c PF: > { %s701_s0 = sshll.u32 %s969_s27, 2 }
  0x3d   : > { %s328_s28 = sadd.s32 %s965_s26, %s701_s0 }
  0x3e   : > { %s329_s29 = sld [smem:[#allocation4 + %s328_s28]] }
  0x44   : > { %p702_p10 = scmp.le.s32.totalorder %s329_s29, 0 }
  0x45   : > { %v843_v1 = vld [vmem:[%s300_s23 + $0x4] ss:$8 sps:$4 sm:$0xff] (!%p702_p10)   ;;  %v845_v2 = vld [vmem:[%s300_s23] ss:$8 sps:$4 sm:$0xff] (!%p702_p10)   ;;  %v989_v3 = vmov (!%p702_p10), 0   ;;  %vm359_vm1 = vcmask (!%p702_p10), 261120  }
  0x46   : > { %333 = sbr.rel (%p702_p10) target bundleno = 540 (0x21c), region = 44  ;;  %395 = vmatprep.mubr.bf16.mxu0 (!%p702_p10), %v989_v3  ;;  %842 = vset.pattern.permute.xlu0 (!%p702_p10), %v989_v3  ;;  %v846_v4 = vld [vmem:[%s300_s23 + $0x14] ss:$8 sps:$4 sm:$0xff] (!%p702_p10)   ;;  %v848_v5 = vld [vmem:[%s300_s23 + $0x10] ss:$8 sps:$4 sm:$0xff] (!%p702_p10)   ;;  %v412_v6 = vld [vmem:[%s317_s15] sm:$0xff] (!%p702_p10) }
  0x47   : > { %363 = vmatprep.subr.bf16.mxu0 (!%p702_p10), %v843_v1  ;;  %415 = vperm.xlu0 (!%p702_p10), %842, %v412_v6   ;;  %v334_v7 = vld [vmem:[%s1123_s8] sm:$0xf] (!%p702_p10)  ;;  %v990_v9 = vmov (!%p702_p10), 0.0   ;;  %v850_v10 = vld [vmem:[%s1132_s21 + $0x8] sm:$0xff] (!%p702_p10)   ;;  %v851_v11 = vld [vmem:[%s1132_s21 + $0x10] sm:$0xff] (!%p702_p10)   ;;  %vm991_vm2 = vmmov (!%p702_p10), 0  }
  0x48   : > { %364 = vmatpush1.bf16.msra.mxu0 (!%p702_p10), %v845_v2  ;;  %v849_v8 = vld [vmem:[%s1132_s21] sm:$0xff] (!%p702_p10)   ;;  %730 = vmatprep.subr.bf16.mxu1 (!%p702_p10), %v990_v9  ;;  %v852_v12 = vld [vmem:[%s1132_s21 + $0x18] sm:$0xff] (!%p702_p10)   ;;  %v854_v14 = vld [vmem:[%s1132_s21 + $0x28] sm:$0xff] (!%p702_p10)  }
  0x49   : > { %365 = vmatprep.subr.bf16.mxu0 (!%p702_p10), %v846_v4  ;;  %731 = vmatpush3.bf16.msra.mxu1 (!%p702_p10), %v849_v8  ;;  %v853_v13 = vld [vmem:[%s1132_s21 + $0x20] sm:$0xff] (!%p702_p10)   ;;  %v855_v15 = vld [vmem:[%s1132_s21 + $0x30] sm:$0xff] (!%p702_p10)   ;;  %v856_v16 = vld [vmem:[%s1132_s21 + $0x38] sm:$0xff] (!%p702_p10)  }
  0x4a   : > { %732 = vmatprep.subr.bf16.mxu1 (!%p702_p10), %v990_v9  ;;  %746 = vmatprep.mubr.msk.bf16.mxu1 (!%p702_p10), %vm991_vm2, %v990_v9  ;;  %v419_v30 = vld [vmem:[#allocation2] sm:$0xff] (!%p702_p10) }
  0x4c   : > { %366 = vmatpush1.bf16.msra.mxu0 (!%p702_p10), %v848_v5 }
  0x4d   : > { %733 = vmatpush3.bf16.msra.mxu1 %v850_v10 }
  0x4e   : > { %734 = vmatprep.subr.bf16.mxu1 %v990_v9 }
  0x4f   : > { %707 = vmatmul.mubr.msk.bf16.vlgmr.msra.gmra.mrb[0].mxu0 %vm359_vm1, %v334_v7 }
  0x51   : > { %735 = vmatpush3.bf16.msra.mxu1 %v851_v11 }
  0x52   : > { %736 = vmatprep.subr.bf16.mxu1 %v990_v9 }
  0x55   : > { %737 = vmatpush3.bf16.msra.mxu1 %v852_v12 }
  0x56   : > { %738 = vmatprep.subr.bf16.mxu1 %v990_v9 }
  0x59   : > { %739 = vmatpush3.bf16.msra.mxu1 %v853_v13 }
  0x5a   : > { %740 = vmatprep.subr.bf16.mxu1 %v990_v9 }
  0x5d   : > { %741 = vmatpush3.bf16.msra.mxu1 %v854_v14 }
  0x5e   : > { %742 = vmatprep.subr.bf16.mxu1 %v990_v9 }
  0x61   : > { %743 = vmatpush3.bf16.msra.mxu1 %v855_v15 }
  0x62   : > { %744 = vmatprep.subr.bf16.mxu1 %v990_v9 }
  0x65   : > { %745 = vmatpush3.bf16.msra.mxu1 %v856_v16 }
  0xc6   : > { %v416_v26 = vpop.permute.xlu0 %415 }
 0x122   : > { %v397_v17 = vpop.f32.mrb[0].mxu0 }
 0x123   : > { %v708_v18 = vmul.f32 -1.442695, %v397_v17  ;;  %v399_v19 = vpop.f32.mrb[1].mxu0 }
 0x124   : > { %v401_v20 = vpop.f32.mrb[2].mxu0 }
 0x125   : > { %857 = vpow2.f32 %v708_v18  ;;  %v402_v21 = vpop.f32.mrb[3].mxu0 }
 0x12f   : > { %v858_v22 = vpop.eup %857 }
 0x130   : > { %v407_v23 = vadd.f32 1.0, %v858_v22 }
 0x132   : > { %859 = vrcp.f32 %v407_v23 }
 0x13c   : > { %v860_v24 = vpop.eup %859 }
 0x13d   : > { %v410_v25 = vmul.f32 %v860_v24, %v397_v17 }
 0x13f   : > { %v411_v27 = vmul.f32 %v410_v25, %v399_v19 }
 0x141   : > { %v418_v28 = vmul.f32 %v416_v26, %v411_v27 }
 0x143   : > { %v420_v29 = vpack.c.bf16 %v418_v28, %v418_v28 }
 0x145   : > { %747 = vmatmul.mubr.bf16.vlgmr.msra.gmra.mrb[0].mxu1 %v420_v29 }
 0x218   : > { %v519_v31 = vpop.f32.mrb[0].mxu1 }
 0x219   : > { %v525_v32 = vadd.f32 %v519_v31, %v419_v30  ;;  %v748_v33 = vpop.f32.mrb[1].mxu1 }
 0x21a   : > { %v522_v34 = vpop.f32.mrb[2].mxu1 }
 0x21b   : > { %526 = vst.msk [vmem:[#allocation2] sm:$0xff] %vm359_vm1, %v525_v32  ;;  %v749_v35 = vpop.f32.mrb[3].mxu1 }
 0x21c PF: > { %p527_p12 = scmp.eq.s32.totalorder %s965_s26, 3  ;;  %p528_p0 = scmp.eq.s32.totalorder %s961_s25, 1 }
 0x21e   : > { %p529_p1 = pnand %p528_p0, %p527_p12 }
 0x21f   : > { %vm534_vm3 = vcmask (!%p529_p1), 261120  }
 0x220   : > { %532 = sbr.rel (%p529_p1) target bundleno = 551 (0x227), region = 48 }
 0x222   : > { %v533_v36 = vld [vmem:[#allocation2] sm:$0xff] (!%p529_p1) }
 0x223   : > { %535 = vst.msk [vmem:[%s287_s30] sm:$0xff] (!%p529_p1), %vm534_vm3, %v533_v36 }
 0x227 PF: > { %s718_s1 = sshll.u32 %s969_s27, 7  ;;  %s1252_s6 = sld [smem:[#allocation21_spill]] }
 0x228   : > { %s550_s25 = sshll.u32 %s287_s30, 4  ;;  %s1254_s26 = sand.u32 1, %s953_s24   ;;  %s551_s25 = int_to_ptr.vmem [resolvable:$true] %s550_s25 }
 0x229   : > { %s537_s11 = scalar_lea.sflag [#allocation6], %s1254_s26  ;;  %s873_s13 = scalar_lea.vmem %s551_s25, 128 }
 0x22a   : > { %p874_p2 = scmp.ne.s32.totalorder %s551_s25, %s873_s13  ;;  %s992_s16 = smov [#allocation5]  }
 0x22b   : > { %s877_s17 = sshll.u32 %s992_s16, 4  ;;  %s878_s17 = int_to_ptr.vmem [resolvable:$false] %s877_s17 }
 0x22c   : > { %p875_p3 = pnand %p874_p2, %p1088_p11  ;;  %s879_s19 = scalar_lea.vmem %s878_s17, 256 }
 0x22d   : > { %s1253_s9 = smov %s1252_s6  ;;  %s1162_s10 = scalar_lea.hbm %s1252_s6, %s718_s1 }
 0x22e   : > { %p876_p4 = pneg %p875_p3  ;;  %p880_p5 = scmp.lt.s32.totalorder %s551_s25, %s878_s17 }
 0x22f   : > { %p881_p6 = scmp.lt.s32.totalorder %s879_s19, %s873_s13 }
 0x231   : > { %p882_p7 = por %p881_p6, %p880_p5 }
 0x233   : > { %p883_p8 = pnand %p882_p7, %p876_p4 }
 0x235   : > { %886 = shalt.err (!%p883_p8)
}
 0x236   : > { %s887_s27 = scalar_lea.hbm %s1162_s10, 128  ;;  %s891_s14 = scalar_lea.hbm %s1253_s9, 256 }
 0x237   : > { %p888_p9 = scmp.ne.s32.totalorder %s1162_s10, %s887_s27  ;;  %p892_p0 = scmp.lt.u32.totalorder %s1162_s10, %s1253_s9 }
 0x238   : > { %p893_p1 = scmp.lt.u32.totalorder %s891_s14, %s887_s27  ;;  %p895_p3 = scmp.lt.u32.totalorder %s887_s27, %s1162_s10 }
 0x239   : > { %p889_p10 = pnand %p888_p9, %p1088_p11 }
 0x23a   : > { %p894_p2 = por %p893_p1, %p892_p0 }
 0x23b   : > { %p890_p12 = pneg %p889_p10 }
 0x23c   : > { %p896_p4 = por %p895_p3, %p894_p2 }
 0x23e   : > { %p897_p5 = pnand %p896_p4, %p890_p12 }
 0x240   : > { %900 = shalt.err (!%p897_p5)
}
 0x241   : > { %750 = dma.vmem_to_hbm [thread:$0]  (%p1088_p11), %s551_s25, 128, %s1162_s10, %s537_s11  }
 0x242 PF: > { %s1255_s7 = sld [smem:[#allocation14_spill]]  ;;  %s1256_s20 = sld [smem:[#allocation9_spill]] }
 0x248   : > { %p756_p6 = scmp.ge.s32.totalorder %s1255_s7, 2  ;;  %s562_s30 = sand.u32 1, %s1256_s20  }
 0x249   : > { %s563_s0 = scalar_lea.sflag [#allocation6], %s562_s30 }
 0x24a   : > { %p753_p7 = pnand %p756_p6, %p1096_p13 }
 0x24c   : > { %944 = dma.done.wait (!%p753_p7), %s563_s0, 128  }
 0x24d   : > { %946 = vsyncadd (!%p753_p7), %s563_s0, 4294967168  ;;  %s24_s6 = sadd.s32 1, %s1255_s7   ;;  %s1258_s28 = sld [smem:[#allocation10_spill]] }
 0x24e   : > { %p21_p8 = scmp.ge.s32.totalorder %s24_s6, 18   ;;  %s1259_s0 = sld [smem:[#allocation19_spill]] }
 0x24f   : > { %s1260_s25 = sld [smem:[#allocation11_spill]]  ;;  %s1261_s26 = sld [smem:[#allocation12_spill]] }
 0x250   : > { %s1262_s27 = sld [smem:[#allocation13_spill]]  ;;  %s1263_s12 = sld [smem:[#allocation15_spill]] }
 0x251   : > { %s1264_s29 = sld [smem:[#allocation16_spill]]  ;;  %s1265_s30 = sld [smem:[#allocation18_spill]] }
 0x252   : > { %s1266_s23 = smov %s953_s24  ;;  %23 = sbr.rel (!%p21_p8) target bundleno = 22 (0x16), region = 92 }
 0x253   : > { %s1267_s24 = smov %s1258_s28 }
 0x256   : > { %s1268_s28 = smov %s1263_s12 }
 0x259   :  { %568 = vsyncpa [#allocation6], 1 }
 0x25a   :  { %570 = vsyncpa [#allocation6 + $0x1], 1 }

</bundles_post_ra>
